<compile_context>
chip_gen: v6e
topology: v6e:2x2x1
jax: 0.10.0
libtpu: 0.0.40
codegen_flags: <defaults>
</compile_context>

<pallas_src>
import functools

import jax
import jax.numpy as jnp
from jax import lax
from jax.experimental import pallas as pl
from jax.experimental.pallas import tpu as pltpu


def _round_up(x, m):
    return (x + m - 1) // m * m


def _vmem_budget_cap():
    """~75% of physical per-core VMEM (generation aware, safe fallback)."""
    try:
        cap = int(pltpu.get_tpu_info().vmem_capacity_bytes)
    except Exception:
        cap = 64 << 20  # v7x-sized conservative fallback
    return max((cap * 3) // 4, 16 << 20)


# ---------------------------------------------------------------------------
# Fused single-pass kernel: pool -> MLP -> sigmoid -> scale, one batch / step.
# ---------------------------------------------------------------------------
def _fused_kernel(x_ref, w1_ref, b1_ref, w2t_ref, b2_ref, o_ref, *, inv_s):
    x = x_ref[0]                                                   # (C, S)
    # Max in native dtype (exact); sum accumulated in f32 (no full f32 copy).
    mx = jnp.max(x, axis=-1, keepdims=True).astype(jnp.float32)    # (C, 1)
    avg = jnp.sum(x, axis=-1, keepdims=True,
                  dtype=jnp.float32) * jnp.float32(inv_s)          # (C, 1)

    w1 = w1_ref[...].astype(jnp.float32)                           # (C, Ch)
    b1 = b1_ref[...].astype(jnp.float32)                           # (1, Ch)
    w2t = w2t_ref[...].astype(jnp.float32)                         # (C, Ch)
    b2 = b2_ref[...].astype(jnp.float32)                           # (C, 1)

    # Layer 1: contract over C (sublane reduce); C never leaves the sublanes.
    h_max = jnp.maximum(jnp.sum(w1 * mx, axis=0, keepdims=True) + b1, 0.0)
    h_avg = jnp.maximum(jnp.sum(w1 * avg, axis=0, keepdims=True) + b1, 0.0)
    # Layer 2 is linear: mlp(max) + mlp(avg) = W2 @ (h_max + h_avg) + 2*b2.
    y = jnp.sum(w2t * (h_max + h_avg), axis=-1, keepdims=True) + 2.0 * b2
    gate = jax.nn.sigmoid(y)                                       # (C, 1) f32

    # Multiply in the input dtype (gate cast once per block).
    o_ref[0] = x * gate.astype(x.dtype)


# ---------------------------------------------------------------------------
# Phase 1: per (batch, C-tile) max / sum over S, accumulated over S tiles.
# stats lane 0 = running max (f32), lane 1 = running sum (f32).
# ---------------------------------------------------------------------------
def _pool_kernel(x_ref, stats_ref, *, rem):
    s_idx = pl.program_id(2)
    n_s = pl.num_programs(2)
    x = x_ref[0]                                                   # (tc, ts)

    def _accum(t_max, t_sum):
        @pl.when(s_idx == 0)
        def _():
            stats_ref[0, :, 0:1] = t_max
            stats_ref[0, :, 1:2] = t_sum

        @pl.when(s_idx > 0)
        def _():
            stats_ref[0, :, 0:1] = jnp.maximum(stats_ref[0, :, 0:1], t_max)
            stats_ref[0, :, 1:2] = stats_ref[0, :, 1:2] + t_sum

    def _full_tile():
        t_max = jnp.max(x, axis=-1, keepdims=True).astype(jnp.float32)
        t_sum = jnp.sum(x, axis=-1, keepdims=True, dtype=jnp.float32)
        _accum(t_max, t_sum)

    if rem:
        # Ragged last S tile: lanes >= rem are unspecified (no wrapper-side
        # padding), so mask them out of both reductions.  Only the last tile
        # pays for the mask; full tiles stay pure load + max + add.
        def _ragged_tile():
            col = lax.broadcasted_iota(jnp.int32, x.shape, 1)
            valid = col < rem
            t_max = jnp.max(
                jnp.where(valid, x, jnp.array(-jnp.inf, dtype=x.dtype)),
                axis=-1, keepdims=True).astype(jnp.float32)
            t_sum = jnp.sum(
                jnp.where(valid, x, jnp.array(0, dtype=x.dtype)),
                axis=-1, keepdims=True, dtype=jnp.float32)
            _accum(t_max, t_sum)

        pl.when(s_idx == n_s - 1)(_ragged_tile)
        pl.when(s_idx < n_s - 1)(_full_tile)
    else:
        _full_tile()


# ---------------------------------------------------------------------------
# Phase 2: elementwise broadcast-scale (native dtype multiply).
# ---------------------------------------------------------------------------
def _scale_kernel(gate_ref, x_ref, o_ref):
    o_ref[0] = x_ref[0] * gate_ref[0].astype(o_ref.dtype)


# ---------------------------------------------------------------------------
# Tile selection: byte-targeted lane tile, optional sublane (C) tiling.
# ---------------------------------------------------------------------------
def _choose_tiles(C, S, itemsize, target_bytes, budget_cap, block_s, block_c):
    # Lane (S) tile.
    if block_s is not None:
        tile_s = max(128, (block_s // 128) * 128)
    else:
        tile_s = _round_up(max(target_bytes // max(C * itemsize, 1), 128), 128)
        tile_s = max(tile_s, 512)
    if tile_s >= S:
        tile_s = S                      # single full-dim block, no masking

    # Sublane (C) tile.
    if block_c is not None:
        tile_c = block_c
    else:
        tile_c = C
        if _round_up(C, 8) * _round_up(tile_s, 128) * itemsize > 2 * target_bytes:
            tile_c = (target_bytes // (_round_up(tile_s, 128) * itemsize)) // 8 * 8
    if tile_c >= C:
        tile_c = C
    else:
        tile_c = max(8, (tile_c // 8) * 8)

    # Final safety clamp so double-buffered in/out blocks (+ temps) fit VMEM.
    max_block = max((budget_cap - (8 << 20)) // 8, 1 << 20)

    def blk(tc, ts):
        return _round_up(tc, 8) * _round_up(ts, 128) * itemsize

    if blk(tile_c, tile_s) > max_block and tile_s > 128:
        tile_s = max(128, (max_block // (_round_up(tile_c, 8) * itemsize))
                     // 128 * 128)
        if tile_s >= S:
            tile_s = S
    if blk(tile_c, tile_s) > max_block and tile_c > 8:
        tile_c = max(8, (max_block // (_round_up(tile_s, 128) * itemsize))
                     // 8 * 8)
        if tile_c >= C:
            tile_c = C
    return tile_c, tile_s


def channel_gate(x, w1, b1, w2, b2, *, target_block_bytes=2 << 20,
                 block_s=None, block_c=None, allow_fused=True):
    """ChannelGate forward.

    x:  (B, C, D, H, W), float dtype.
    w1: (C, Ch) = linear1.weight.T      b1: (Ch,)
    w2: (Ch, C) = linear2.weight.T      b2: (C,)
    """
    B, C, D, H, W = x.shape
    S = D * H * W
    Ch = w1.shape[1]
    dt = x.dtype
    itemsize = jnp.dtype(dt).itemsize
    budget_cap = _vmem_budget_cap()

    x_flat = x.reshape(B, C, S)     # no padding: ragged tiles handled in-kernel

    # ------------------------------------------------------------------
    # Fused single-pass path (1 HBM read + 1 HBM write) when it fits VMEM.
    # ------------------------------------------------------------------
    c_pad = _round_up(C, 8)
    slab_bytes = c_pad * _round_up(S, 128) * itemsize
    w_pad_bytes = c_pad * _round_up(max(Ch, 1), 128) * 4
    fused_need = 4 * slab_bytes + 6 * w_pad_bytes + (8 << 20)
    if (allow_fused and block_s is None and block_c is None
            and fused_need <= budget_cap):
        b1r = b1.reshape(1, Ch)
        b2c = b2.reshape(C, 1)
        w2t = jnp.transpose(w2)                    # (C, Ch) == PyTorch W2
        fused_cost = pl.CostEstimate(
            flops=3 * B * C * S + 6 * B * C * Ch,
            transcendentals=B * C,
            bytes_accessed=2 * B * C * S * itemsize + 2 * C * Ch * 4,
        )
        out_flat = pl.pallas_call(
            functools.partial(_fused_kernel, inv_s=1.0 / S),
            out_shape=jax.ShapeDtypeStruct((B, C, S), dt),
            grid_spec=pltpu.PrefetchScalarGridSpec(
                num_scalar_prefetch=0,
                grid=(B,),
                in_specs=[
                    pl.BlockSpec((1, C, S), lambda b: (b, 0, 0)),
                    pl.BlockSpec((C, Ch), lambda b: (0, 0)),
                    pl.BlockSpec((1, Ch), lambda b: (0, 0)),
                    pl.BlockSpec((C, Ch), lambda b: (0, 0)),
                    pl.BlockSpec((C, 1), lambda b: (0, 0)),
                ],
                out_specs=pl.BlockSpec((1, C, S), lambda b: (b, 0, 0)),
            ),
            compiler_params=pltpu.CompilerParams(
                dimension_semantics=("parallel",),
                vmem_limit_bytes=int(min(max(fused_need, 32 << 20), budget_cap)),
            ),
            cost_estimate=fused_cost,
        )(x_flat, w1, b1r, w2t, b2c)
        return out_flat.reshape(B, C, D, H, W)

    # ------------------------------------------------------------------
    # Two-phase path.
    # ------------------------------------------------------------------
    tile_c, tile_s = _choose_tiles(C, S, itemsize, target_block_bytes,
                                   budget_cap, block_s, block_c)
    n_c = pl.cdiv(C, tile_c)
    n_s = pl.cdiv(S, tile_s)
    rem = S % tile_s if (tile_s < S and S % tile_s != 0) else 0

    x_blk = _round_up(tile_c, 8) * _round_up(tile_s, 128) * itemsize
    tmp_blk = _round_up(tile_c, 8) * _round_up(tile_s, 128) * 4
    stats_blk = _round_up(tile_c, 8) * 128 * 4

    # ---------------- phase 1: pooled statistics (B, C, 2) f32 ----------
    pool_need = 4 * x_blk + tmp_blk + 2 * stats_blk + (4 << 20)
    pool_cost = pl.CostEstimate(
        flops=2 * B * C * S, transcendentals=0,
        bytes_accessed=B * C * S * itemsize + B * C * 2 * 4)
    stats = pl.pallas_call(
        functools.partial(_pool_kernel, rem=rem),
        out_shape=jax.ShapeDtypeStruct((B, C, 2), jnp.float32),
        grid_spec=pltpu.PrefetchScalarGridSpec(
            num_scalar_prefetch=0,
            grid=(B, n_c, n_s),
            in_specs=[pl.BlockSpec((1, tile_c, tile_s),
                                   lambda b, c, s: (b, c, s))],
            out_specs=pl.BlockSpec((1, tile_c, 2), lambda b, c, s: (b, c, 0)),
        ),
        compiler_params=pltpu.CompilerParams(
            dimension_semantics=("parallel", "parallel", "arbitrary"),
            vmem_limit_bytes=int(min(max(pool_need, 32 << 20), budget_cap)),
        ),
        cost_estimate=pool_cost,
    )(x_flat)

    # ------- tiny shared MLP + sigmoid, hoisted to one batched matmul -------
    mx = stats[..., 0]                                      # (B, C) f32
    avg = stats[..., 1] / jnp.float32(S)                    # true-S mean
    pooled = jnp.concatenate([mx, avg], axis=0)             # (2B, C)
    h = jnp.maximum(
        pooled @ w1.astype(jnp.float32) + b1.astype(jnp.float32), 0.0)
    y = h @ w2.astype(jnp.float32) + b2.astype(jnp.float32)
    gate = jax.nn.sigmoid(y[:B] + y[B:])[:, :, None]        # (B, C, 1) f32

    # ---------------- phase 2: elementwise scale ----------------
    scale_need = 4 * x_blk + 2 * stats_blk + (4 << 20)
    scale_cost = pl.CostEstimate(
        flops=B * C * S, transcendentals=0,
        bytes_accessed=2 * B * C * S * itemsize + B * C * 4)
    # TODO(synk): if the caller donates x, alias it to the output via
    # input_output_aliases={1: 0} to drop the extra output allocation.
    out_flat = pl.pallas_call(
        _scale_kernel,
        out_shape=jax.ShapeDtypeStruct((B, C, S), dt),
        grid_spec=pltpu.PrefetchScalarGridSpec(
            num_scalar_prefetch=0,
            grid=(B, n_c, n_s),
            in_specs=[pl.BlockSpec((1, tile_c, 1), lambda b, c, s: (b, c, 0)),
                      pl.BlockSpec((1, tile_c, tile_s),
                                   lambda b, c, s: (b, c, s))],
            out_specs=pl.BlockSpec((1, tile_c, tile_s),
                                   lambda b, c, s: (b, c, s)),
        ),
        compiler_params=pltpu.CompilerParams(
            dimension_semantics=("parallel", "parallel", "parallel"),
            vmem_limit_bytes=int(min(max(scale_need, 32 << 20), budget_cap)),
        ),
        cost_estimate=scale_cost,
    )(gate, x_flat)
    return out_flat.reshape(B, C, D, H, W)


def channel_gate_reference(x, w1, b1, w2, b2):
    """Plain-JAX reference mirroring the PyTorch forward."""
    B, C = x.shape[0], x.shape[1]
    x_flat = x.reshape(B, C, -1).astype(jnp.float32)
    mx = jnp.max(x_flat, axis=-1)
    avg = jnp.mean(x_flat, axis=-1)

    def mlp(v):
        h = jnp.maximum(v @ w1 + b1, 0.0)
        return h @ w2 + b2

    gate = jax.nn.sigmoid(mlp(mx) + mlp(avg))
    return (gate[:, :, None, None, None] * x.astype(jnp.float32)).astype(x.dtype)


if __name__ == "__main__":
    def make_inputs(key, B, C, r, D, H, W):
        Ch = C // r
        kx, k1, k2, k3, k4 = jax.random.split(key, 5)
        x = jax.random.normal(kx, (B, C, D, H, W), dtype=jnp.float32) - 4.0
        w1 = jax.random.normal(k1, (C, Ch), dtype=jnp.float32) * 0.5   # W1.T
        b1 = jax.random.normal(k2, (Ch,), dtype=jnp.float32) * 0.1
        w2 = jax.random.normal(k3, (Ch, C), dtype=jnp.float32) * 0.5   # W2.T
        b2 = jax.random.normal(k4, (C,), dtype=jnp.float32) * 0.1
        return x, w1, b1, w2, b2

    # Case 1: ChannelGate(channels=4, r=2); S = 3*7*7 = 147 (not 128-aligned);
    # all-negative input would expose an unmasked padded max.
    x, w1, b1, w2, b2 = make_inputs(jax.random.PRNGKey(0), 2, 4, 2, 3, 7, 7)
    ref = channel_gate_reference(x, w1, b1, w2, b2)

    out_fused = channel_gate(x, w1, b1, w2, b2)              # fused path
    jax.block_until_ready(out_fused)
    assert out_fused.shape == x.shape
    assert jnp.allclose(out_fused, ref, atol=1e-5, rtol=1e-5), "fused mismatch"

    out_2p = channel_gate(x, w1, b1, w2, b2, allow_fused=False)   # single S tile
    jax.block_until_ready(out_2p)
    assert jnp.allclose(out_2p, ref, atol=1e-5, rtol=1e-5), "two-phase mismatch"

    out_tiled = channel_gate(x, w1, b1, w2, b2, allow_fused=False,
                             block_s=128)                    # ragged last S tile
    jax.block_until_ready(out_tiled)
    assert jnp.allclose(out_tiled, ref, atol=1e-5, rtol=1e-5), "ragged-S mismatch"

    # Case 2: C tiling (ragged last C block) + multi-tile S with no remainder.
    x2, w12, b12, w22, b22 = make_inputs(jax.random.PRNGKey(1), 1, 12, 2, 4, 8, 8)
    ref2 = channel_gate_reference(x2, w12, b12, w22, b22)
    out2 = channel_gate(x2, w12, b12, w22, b22, allow_fused=False,
                        block_s=128, block_c=8)
    jax.block_until_ready(out2)
    assert jnp.allclose(out2, ref2, atol=1e-5, rtol=1e-5), "C-tiled mismatch"

    print("KERNEL_OK")
</pallas_src>

<mosaic_0001>
module attributes {stable_mosaic.version = 11 : i64} {
  func.func @_fused_kernel(%arg0: i32, %arg1: memref<1x4x147xf32, #tpu.memory_space<vmem>>, %arg2: memref<4x2xf32, #tpu.memory_space<vmem>>, %arg3: memref<1x2xf32, #tpu.memory_space<vmem>>, %arg4: memref<4x2xf32, #tpu.memory_space<vmem>>, %arg5: memref<4x1xf32, #tpu.memory_space<vmem>>, %arg6: memref<1x4x147xf32, #tpu.memory_space<vmem>>) attributes {dimension_semantics = [#tpu.dimension_semantics<parallel>], iteration_bounds = array<i64: 2>, scalar_prefetch = 0 : i64, scratch_operands = 0 : i64, tpu.core_type = #tpu.core_type<tc>, window_params = [{transform_indices = @transform_0, window_bounds = array<i64: 1, 4, 147>}, {pipeline_mode = #tpu.pipeline_mode<synchronous>, transform_indices = @transform_1, window_bounds = array<i64: 4, 2>}, {pipeline_mode = #tpu.pipeline_mode<synchronous>, transform_indices = @transform_2, window_bounds = array<i64: 1, 2>}, {pipeline_mode = #tpu.pipeline_mode<synchronous>, transform_indices = @transform_3, window_bounds = array<i64: 4, 2>}, {pipeline_mode = #tpu.pipeline_mode<synchronous>, transform_indices = @transform_4, window_bounds = array<i64: 4, 1>}, {transform_indices = @transform_5, window_bounds = array<i64: 1, 4, 147>}]} {
    %c0 = arith.constant 0 : index
    %c0_0 = arith.constant 0 : index
    %c0_1 = arith.constant 0 : index
    %0 = vector.load %arg1[%c0, %c0_0, %c0_1] : memref<1x4x147xf32, #tpu.memory_space<vmem>>, vector<1x4x147xf32>
    %1 = vector.shape_cast %0 : vector<1x4x147xf32> to vector<4x147xf32>
    %cst = arith.constant dense<0xFF800000> : vector<4xf32>
    %2 = vector.multi_reduction <maximumf>, %1, %cst [1] : vector<4x147xf32> to vector<4xf32>
    %3 = vector.shape_cast %2 : vector<4xf32> to vector<4x1xf32>
    %cst_2 = arith.constant dense<0.000000e+00> : vector<4xf32>
    %4 = vector.multi_reduction <add>, %1, %cst_2 [1] : vector<4x147xf32> to vector<4xf32>
    %5 = vector.shape_cast %4 : vector<4xf32> to vector<4x1xf32>
    %cst_3 = arith.constant 0.00680272094 : f32
    %6 = vector.broadcast %cst_3 : f32 to vector<4x1xf32>
    %7 = arith.mulf %5, %6 : vector<4x1xf32>
    %c0_4 = arith.constant 0 : index
    %c0_5 = arith.constant 0 : index
    %8 = vector.load %arg2[%c0_4, %c0_5] : memref<4x2xf32, #tpu.memory_space<vmem>>, vector<4x2xf32>
    %c0_6 = arith.constant 0 : index
    %c0_7 = arith.constant 0 : index
    %9 = vector.load %arg3[%c0_6, %c0_7] : memref<1x2xf32, #tpu.memory_space<vmem>>, vector<1x2xf32>
    %c0_8 = arith.constant 0 : index
    %c0_9 = arith.constant 0 : index
    %10 = vector.load %arg4[%c0_8, %c0_9] : memref<4x2xf32, #tpu.memory_space<vmem>>, vector<4x2xf32>
    %c0_10 = arith.constant 0 : index
    %c0_11 = arith.constant 0 : index
    %11 = vector.load %arg5[%c0_10, %c0_11] : memref<4x1xf32, #tpu.memory_space<vmem>>, vector<4x1xf32>
    %12 = vector.broadcast %3 : vector<4x1xf32> to vector<4x2xf32>
    %13 = arith.mulf %8, %12 : vector<4x2xf32>
    %cst_12 = arith.constant dense<0.000000e+00> : vector<2xf32>
    %14 = vector.multi_reduction <add>, %13, %cst_12 [0] : vector<4x2xf32> to vector<2xf32>
    %15 = vector.shape_cast %14 : vector<2xf32> to vector<1x2xf32>
    %16 = arith.addf %15, %9 : vector<1x2xf32>
    %cst_13 = arith.constant 0.000000e+00 : f32
    %17 = vector.broadcast %cst_13 : f32 to vector<1x2xf32>
    %18 = arith.maximumf %16, %17 : vector<1x2xf32>
    %19 = vector.broadcast %7 : vector<4x1xf32> to vector<4x2xf32>
    %20 = arith.mulf %8, %19 : vector<4x2xf32>
    %cst_14 = arith.constant dense<0.000000e+00> : vector<2xf32>
    %21 = vector.multi_reduction <add>, %20, %cst_14 [0] : vector<4x2xf32> to vector<2xf32>
    %22 = vector.shape_cast %21 : vector<2xf32> to vector<1x2xf32>
    %23 = arith.addf %22, %9 : vector<1x2xf32>
    %cst_15 = arith.constant 0.000000e+00 : f32
    %24 = vector.broadcast %cst_15 : f32 to vector<1x2xf32>
    %25 = arith.maximumf %23, %24 : vector<1x2xf32>
    %26 = arith.addf %18, %25 : vector<1x2xf32>
    %27 = vector.broadcast %26 : vector<1x2xf32> to vector<4x2xf32>
    %28 = arith.mulf %10, %27 : vector<4x2xf32>
    %cst_16 = arith.constant dense<0.000000e+00> : vector<4xf32>
    %29 = vector.multi_reduction <add>, %28, %cst_16 [1] : vector<4x2xf32> to vector<4xf32>
    %30 = vector.shape_cast %29 : vector<4xf32> to vector<4x1xf32>
    %cst_17 = arith.constant 2.000000e+00 : f32
    %31 = vector.broadcast %cst_17 : f32 to vector<4x1xf32>
    %32 = arith.mulf %31, %11 : vector<4x1xf32>
    %33 = arith.addf %30, %32 : vector<4x1xf32>
    %34 = arith.negf %33 : vector<4x1xf32>
    %35 = math.exp %34 : vector<4x1xf32>
    %cst_18 = arith.constant 1.000000e+00 : f32
    %36 = vector.broadcast %cst_18 : f32 to vector<4x1xf32>
    %37 = arith.addf %36, %35 : vector<4x1xf32>
    %38 = arith.divf %36, %37 : vector<4x1xf32>
    %39 = vector.broadcast %38 : vector<4x1xf32> to vector<4x147xf32>
    %40 = arith.mulf %1, %39 : vector<4x147xf32>
    %c0_19 = arith.constant 0 : index
    %c0_20 = arith.constant 0 : index
    %c0_21 = arith.constant 0 : index
    %41 = vector.load %arg6[%c0_19, %c0_20, %c0_21] : memref<1x4x147xf32, #tpu.memory_space<vmem>>, vector<1x4x147xf32>
    %42 = vector.shape_cast %41 : vector<1x4x147xf32> to vector<4x147xf32>
    %43 = vector.shape_cast %40 : vector<4x147xf32> to vector<1x4x147xf32>
    tpu.vector_store %arg6[%c0_19, %c0_20, %c0_21], %43 {strides = array<i32>} : memref<1x4x147xf32, #tpu.memory_space<vmem>>, vector<1x4x147xf32>,
    return
  }
  func.func @transform_0(%arg0: i32) -> (i32, i32, i32) {
    %c0_i32 = arith.constant 0 : i32
    %c0_i32_0 = arith.constant 0 : i32
    %c0_i32_1 = arith.constant 0 : i32
    return %arg0, %c0_i32, %c0_i32_0 : i32, i32, i32
  }
  func.func @transform_1(%arg0: i32) -> (i32, i32) {
    %c0_i32 = arith.constant 0 : i32
    %c0_i32_0 = arith.constant 0 : i32
    %c0_i32_1 = arith.constant 0 : i32
    return %c0_i32, %c0_i32_0 : i32, i32
  }
  func.func @transform_2(%arg0: i32) -> (i32, i32) {
    %c0_i32 = arith.constant 0 : i32
    %c0_i32_0 = arith.constant 0 : i32
    %c0_i32_1 = arith.constant 0 : i32
    return %c0_i32, %c0_i32_0 : i32, i32
  }
  func.func @transform_3(%arg0: i32) -> (i32, i32) {
    %c0_i32 = arith.constant 0 : i32
    %c0_i32_0 = arith.constant 0 : i32
    %c0_i32_1 = arith.constant 0 : i32
    return %c0_i32, %c0_i32_0 : i32, i32
  }
  func.func @transform_4(%arg0: i32) -> (i32, i32) {
    %c0_i32 = arith.constant 0 : i32
    %c0_i32_0 = arith.constant 0 : i32
    %c0_i32_1 = arith.constant 0 : i32
    return %c0_i32, %c0_i32_0 : i32, i32
  }
  func.func @transform_5(%arg0: i32) -> (i32, i32, i32) {
    %c0_i32 = arith.constant 0 : i32
    %c0_i32_0 = arith.constant 0 : i32
    %c0_i32_1 = arith.constant 0 : i32
    return %arg0, %c0_i32, %c0_i32_0 : i32, i32, i32
  }
}

</mosaic_0001>

<bundles_post_ra>
// kernel: tpu_custom_call.1
= control target key start
LH: loop header
LB: loop body
LE: loop exit
PB: predicated region body
PF: predicated region fallthrough
CT: control target
= control target key end

     0   :  { %10 = vsyncpa [#allocation3], 0  ;;  %s642_s0 = inlined_call_operand.vmem [shape: f32[2,4,147], index: 0, kind: input, shape index: {}]   ;;  %s643_s1 = inlined_call_operand.vmem [shape: f32[4,2], index: 1, kind: input, shape index: {}]   ;;  %s644_s2 = inlined_call_operand.vmem [shape: f32[1,2], index: 2, kind: input, shape index: {}]   ;;  %s645_s3 = inlined_call_operand.vmem [shape: f32[4,2], index: 3, kind: input, shape index: {}]   ;;  %s646_s4 = inlined_call_operand.vmem [shape: f32[4,1], index: 4, kind: input, shape index: {}]   ;;  %s647_s5 = inlined_call_operand.hbm [shape: f32[2,4,147], index: 5, kind: output, shape index: {}]  }
   0x1   :  { %12 = vsyncpa [#allocation3 + $0x1], 0  ;;  %s530_s18 = smov 0   ;;  %s532_s19 = smov 0  }
   0x2   :  { %s534_s20 = smov 0   ;;  %s536_s21 = smov 0  }
   0x3 LB: > { %s551_s22 = sadd.s32 4294967295, %s495_s21   ;;  %s372_s23 = sadd.s32 4294967294, %s495_s21   ;;  %s495_s21 = sphi %s536_s21, %s653_s21   ;;  %s491_s20 = sphi %s534_s20, %s652_s20   ;;  %s487_s19 = sphi %s532_s19, %s651_s19   ;;  %s483_s18 = sphi %s530_s18, %s650_s18  }
   0x4   : > { %s555_s24 = sadd.s32 1, %s495_s21   ;;  %s135_s25 = sadd.s32 1, %s491_s20 }
   0x5   : > { %s132_s26 = ssub.s32 %s495_s21, %s555_s24  ;;  %p145_p0 = scmp.ne.s32.totalorder %s491_s20, %s487_s19 }
   0x6   : > { %p133_p1 = scmp.eq.s32.totalorder %s132_s26, 0  ;;  %p146_p2 = scmp.eq.s32.totalorder %s551_s22, 1 }
   0x7   : > { %p151_p3 = scmp.ne.s32.totalorder %s487_s19, %s483_s18  ;;  %p152_p4 = scmp.eq.s32.totalorder %s372_s23, 1 }
   0x8   : > { %s566_s27 = scalar_select %p133_p1, %s491_s20, %s135_s25  }
   0x9   : > { %p568_p5 = por %p146_p2, %p145_p0  ;;  %p572_p6 = por %p152_p4, %p151_p3 }
   0xa   : > { %p375_p7 = scmp.ge.s32.totalorder %s495_s21, 1  ;;  %p190_p8 = scmp.lt.s32.totalorder %s495_s21, 3 }
   0xc   : > { %p191_p9 = pnand %p375_p7, %p190_p8 }
   0xd   : > { %p218_p10 = scmp.lt.s32.totalorder (!%p191_p9), %s551_s22, 1  ;;  %s215_s23 = sand.u32 (!%p191_p9), 1, %s487_s19  }
   0xe   : > { %194 = sbr.rel (%p191_p9) target bundleno = 510 (0x1fe), region = 40  ;;  %s376_s25 = sshll.u32 (!%p191_p9), %s215_s23, 3 }
   0xf   : > { %s386_s26 = sshll.u32 (!%p191_p9), %s551_s22, 7  ;;  %s299_s10 = scalar_lea.sflag (!%p191_p9), [#allocation3], %s215_s23 }
  0x13   : > { %s219_s30 = scalar_select %p218_p10, %s551_s22, 1  ;;  %vm227_vm0 = vcmask 1043456   ;;  %vm229_vm1 = vcmask 150528   ;;  %v240_v9 = vld [vmem:[%s643_s1] sm:$0xf]  ;;  %vm245_vm2 = vcmask 11264   ;;  %v266_v25 = vlaneseq }
  0x14   : > { %v241_v26 = vld [vmem:[%s644_s2] sm:$0x1]  ;;  %v497_v41 = vmov 0   ;;  %v498_v50 = vmov 839922192   ;;  %vm295_vm3 = vcmask 154628  }
  0x15   : > { %s385_s6 = sshll.u32 %s219_s30, 3  ;;  %v267_v31 = vshrl.u32 %v266_v25, 7  ;;  %v242_v37 = vld [vmem:[%s645_s3] sm:$0xf]  ;;  %428 = vset.pattern.permute.xlu1 %v497_v41  ;;  %429 = vset.pattern.permute.xlu0 %v497_v41  ;;  %v287_v51 = vunpack.c.l.s4 %v498_v50  ;;  %s217_s30 = scalar_lea.vmem [#allocation2], %s376_s25  ;;  %vm296_vm4 = vmor %vm295_vm3, %vm227_vm0 }
  0x16   : > { %s222_s9 = scalar_lea.vmem %s642_s0, %s385_s6  ;;  %v243_v42 = vld [vmem:[%s646_s4] sm:$0xf]  ;;  %s313_s6 = sshll.u32 %s217_s30, 4  ;;  %s314_s6 = int_to_ptr.vmem [resolvable:$true] %s313_s6 }
  0x17   : > { %v583_v0 = vld [vmem:[%s222_s9] sm:$0xff]  ;;  %v268_v35 = vsub.s32 0, %v267_v31  ;;  %v274_v43 = vmul.f32 2.0, %v243_v42  ;;  %v288_v52 = vunpack.c.0.s8 %v287_v51  ;;  %s311_s9 = scalar_lea.hbm %s647_s5, %s386_s26  ;;  %s435_s11 = scalar_lea.vmem %s314_s6, 128 }
  0x18   : > { %v225_v1 = vcombine.high %v583_v0, %v583_v0  ;;  %v234_v2 = vsel %vm227_vm0, %v583_v0, 0.0  ;;  %v228_v4 = vsel %vm227_vm0, %v583_v0, -inf  ;;  %p436_p11 = scmp.ne.s32.totalorder %s314_s6, %s435_s11  ;;  %s499_s22 = smov [#allocation2]  }
  0x19   : > { %v291_v53 = vsub.s32 %v288_v52, %v267_v31  ;;  %s439_s12 = sshll.u32 %s499_s22, 4  ;;  %s440_s12 = int_to_ptr.vmem [resolvable:$false] %s439_s12 }
  0x1a   : > { %v235_v3 = vsel %vm229_vm1, %v225_v1, 0.0  ;;  %v230_v5 = vsel %vm229_vm1, %v225_v1, -inf  ;;  %p437_p12 = pnand %p436_p11, %p568_p5  ;;  %s441_s13 = scalar_lea.vmem %s440_s12, 256 }
  0x1b   : > { %v236_v6 = vadd.f32 %v235_v3, %v234_v2  ;;  %v231_v7 = vmax.f32 %v228_v4, %v230_v5  ;;  %p442_p0 = scmp.lt.s32.totalorder %s314_s6, %s440_s12  ;;  %p443_p1 = scmp.lt.s32.totalorder %s441_s13, %s435_s11 }
  0x1c   : > { %p438_p13 = pneg %p437_p12 }
  0x1d   : > { %237 = vadd.xlane.f32.xlu0 %v236_v6  ;;  %p444_p2 = por %p443_p1, %p442_p0 }
  0x1f   : > { %p445_p3 = pnand %p444_p2, %p438_p13 }
  0x21   : > { %232 = vmax.xlane.f32.xlu0 %v231_v7 }
  0xa6   : > { %v238_v8 = vpop.xlane.xlu0 %237 }
  0xa7   : > { %v239_v10 = vmul.f32 0.006802721, %v238_v8 }
  0xa9   : > { %v255_v11 = vmul.f32 %v240_v9, %v239_v10 }
  0xaa   : > { %v233_v12 = vpop.xlane.xlu0 %232 }
  0xab   : > { %v244_v13 = vmul.f32 %v240_v9, %v233_v12  ;;  %v256_v14 = vsel %vm245_vm2, %v255_v11, 0.0 }
  0xac   : > { %v257_v15 = vrot.slane %v256_v14, 4 }
  0xad   : > { %v246_v16 = vsel %vm245_vm2, %v244_v13, 0.0 }
  0xae   : > { %v247_v17 = vrot.slane %v246_v16, 4  ;;  %v258_v18 = vadd.f32 %v257_v15, %v256_v14 }
  0xb0   : > { %v248_v19 = vadd.f32 %v247_v17, %v246_v16  ;;  %v259_v20 = vrot.slane %v258_v18, 2 }
  0xb2   : > { %v249_v21 = vrot.slane %v248_v19, 2  ;;  %v260_v22 = vadd.f32 %v259_v20, %v258_v18 }
  0xb4   : > { %v250_v23 = vadd.f32 %v249_v21, %v248_v19  ;;  %v261_v24 = vrot.slane %v260_v22, 1 }
  0xb6   : > { %v251_v27 = vrot.slane %v250_v23, 1  ;;  %v262_v28 = vadd.f32 %v261_v24, %v260_v22 }
  0xb8   : > { %v252_v29 = vadd.f32 %v251_v27, %v250_v23  ;;  %v263_v30 = vadd.f32 %v262_v28, %v241_v26 }
  0xba   : > { %v253_v32 = vadd.f32 %v252_v29, %v241_v26  ;;  %v264_v34 = vmax.f32 %v263_v30, 0.0 }
  0xbc   : > { %v254_v33 = vmax.f32 %v253_v32, 0.0 }
  0xbe   : > { %v265_v36 = vadd.f32 %v264_v34, %v254_v33 }
  0xc0   : > { %v269_v38 = vrot.slane %v265_v36, %v268_v35 }
  0xc2   : > { %v270_v39 = vmul.f32 %v269_v38, %v242_v37 }
  0xc4   : > { %v271_v40 = vsel %vm245_vm2, %v270_v39, 0.0 }
  0xc5   : > { %272 = vadd.xlane.f32.xlu1 %v271_v40 }
 0x14e   : > { %v273_v44 = vpop.xlane.xlu1 %272 }
 0x14f   : > { %v275_v45 = vadd.f32 %v274_v43, %v273_v44 }
 0x151   : > { %v379_v46 = vmul.f32 -1.442695, %v275_v45 }
 0x153   : > { %431 = vpow2.f32 %v379_v46 }
 0x160   : > { %v432_v47 = vpop.eup %431 }
 0x161   : > { %v279_v48 = vadd.f32 1.0, %v432_v47 }
 0x163   : > { %433 = vrcp.f32 %v279_v48 }
 0x170   : > { %v434_v49 = vpop.eup %433 }
 0x171   : > { %284 = vperm.xlu1 %428, %v434_v49  }
 0x1ec   : > { %v285_v54 = vpop.permute.xlu1 %284 }
 0x1ed   : > { %v292_v55 = vrot.slane %v285_v54, %v291_v53 }
 0x1ef   : > { %v294_v56 = vmul.f32 %v292_v55, %v583_v0 }
 0x1f1   : > { %297 = vst.msk [vmem:[%s217_s30] sm:$0xff] %vm296_vm4, %v294_v56 }
 0x1f2   : > { %448 = shalt.err (!%p445_p3)
}
 0x1f3   : > { %s449_s14 = scalar_lea.hbm %s311_s9, 128  ;;  %s453_s17 = scalar_lea.hbm %s647_s5, 256 }
 0x1f4   : > { %p450_p4 = scmp.ne.s32.totalorder %s311_s9, %s449_s14  ;;  %p454_p9 = scmp.lt.s32.totalorder %s311_s9, %s647_s5 }
 0x1f5   : > { %p455_p10 = scmp.lt.s32.totalorder %s453_s17, %s449_s14 }
 0x1f6   : > { %p451_p7 = pnand %p450_p4, %p568_p5 }
 0x1f7   : > { %p456_p11 = por %p455_p10, %p454_p9 }
 0x1f8   : > { %p452_p8 = pneg %p451_p7 }
 0x1fa   : > { %p457_p12 = pnand %p456_p11, %p452_p8 }
 0x1fc   : > { %460 = shalt.err (!%p457_p12)
}
 0x1fd   : > { %387 = dma.vmem_to_hbm [thread:$0]  (%p568_p5), %s314_s6, 128, %s311_s9, %s299_s10  }
 0x1fe PF: > { %p393_p13 = scmp.ge.s32.totalorder %s495_s21, 2  ;;  %s325_s26 = sand.u32 1, %s483_s18  }
 0x1ff   : > { %s326_s30 = scalar_lea.sflag [#allocation3], %s325_s26 }
 0x200   : > { %p390_p0 = pnand %p393_p13, %p572_p6 }
 0x202   : > { %p391_p1 = pneg %p390_p0 }
 0x204   : > { %478 = dma.done.wait (%p391_p1), %s326_s30, 128  }
 0x205   : > { %480 = vsyncadd (%p391_p1), %s326_s30, 4294967168  ;;  %p15_p2 = scmp.ge.s32.totalorder %s555_s24, 4   ;;  %s650_s18 = smov %s487_s19 }
 0x206   : > { %s651_s19 = smov %s491_s20  ;;  %s652_s20 = smov %s566_s27 }
 0x207   : > { %s653_s21 = smov %s555_s24  ;;  %17 = sbr.rel (!%p15_p2) target bundleno = 3 (0x3), region = 75 }
 0x20c   :  { %331 = vsyncpa [#allocation3], 1 }
 0x20d   :  { %333 = vsyncpa [#allocation3 + $0x1], 1 }

</bundles_post_ra>
